<compile_context>
chip_gen: v5e
topology: v5e:2x2
jax: 0.10.0
libtpu: 0.0.40
codegen_flags: <defaults>
</compile_context>

<pallas_src>
import functools

import jax
import jax.numpy as jnp
from jax.experimental import pallas as pl
from jax.experimental.pallas import tpu as pltpu

FEAT = 784
HID = 16
OUT = 10


def mlp_kernel(x_ref, w1_ref, b1_ref, w2_ref, b2_ref, w3_ref, b3_ref, o_ref):
    # In-kernel cast to bf16 (no-op if x already bf16); f32 accumulation on the MXU.
    x = x_ref[...].astype(jnp.bfloat16)
    # hidden1 + ReLU
    h1 = jnp.dot(x, w1_ref[...], preferred_element_type=jnp.float32)
    h1 = jnp.maximum(h1 + b1_ref[...], 0.0)
    # hidden2 + ReLU
    h2 = jnp.dot(h1.astype(jnp.bfloat16), w2_ref[...],
                 preferred_element_type=jnp.float32)
    h2 = jnp.maximum(h2 + b2_ref[...], 0.0)
    # output (no activation)
    out = jnp.dot(h2.astype(jnp.bfloat16), w3_ref[...],
                  preferred_element_type=jnp.float32)
    o_ref[...] = (out + b3_ref[...]).astype(o_ref.dtype)


@functools.partial(jax.jit, static_argnames=("tb",))
def feedforward_mnist_reg(x, w1, b1, w2, b2, w3, b3, *, tb=2048):
    """x: [B, 784] f32 or bf16. Weights [in, out], biases [1, out]. Returns [B, 10] f32.

    tb: batch tile size (multiple of 8). 2048 keeps double-buffered f32 x tiles well
        under v7x's scoped VMEM; sweep up to 4096-8192 on v5e/v6e if desired.
    """
    B = x.shape[0]

    # Pick the batch tile. Either the block's 2nd-to-last dim equals the full batch
    # (always legal) or it is a multiple of 8 (tb is). Split moderately large batches
    # into >=2 grid steps so v7x's two TensorCores both get work.
    if B > tb:
        TB = tb
    elif B >= 1024:
        TB = max(8, (((B + 1) // 2 + 7) // 8) * 8)   # ~half the batch, 8-aligned
    else:
        TB = B
    grid = (pl.cdiv(B, TB),)

    # Tiny one-time weight casts (bf16 operands, f32 accumulate). Biases stay f32.
    w1_b = w1.astype(jnp.bfloat16)
    w2_b = w2.astype(jnp.bfloat16)
    w3_b = w3.astype(jnp.bfloat16)
    b1_f = b1.astype(jnp.float32)
    b2_f = b2.astype(jnp.float32)
    b3_f = b3.astype(jnp.float32)

    x_bytes = jnp.dtype(x.dtype).itemsize
    flops = 2 * B * (FEAT * HID + HID * HID + HID * OUT)
    bytes_accessed = (
        B * FEAT * x_bytes                                    # x stream (dominant)
        + (FEAT * HID + HID * HID + HID * OUT) * 2            # weights (bf16)
        + (HID + HID + OUT) * 4                               # biases (f32)
        + B * OUT * 4                                         # output (f32)
    )

    out = pl.pallas_call(
        mlp_kernel,
        out_shape=jax.ShapeDtypeStruct((B, OUT), jnp.float32),
        grid=grid,
        in_specs=[
            # x: tiled along batch, double-buffered by the Pallas pipeline.
            # Last block dim == full array dim (784), so no feature padding needed.
            pl.BlockSpec((TB, FEAT), lambda i: (i, 0)),
            # Weights / biases: same block every iteration -> VMEM-resident.
            pl.BlockSpec((FEAT, HID), lambda i: (0, 0)),
            pl.BlockSpec((1, HID), lambda i: (0, 0)),
            pl.BlockSpec((HID, HID), lambda i: (0, 0)),
            pl.BlockSpec((1, HID), lambda i: (0, 0)),
            pl.BlockSpec((HID, OUT), lambda i: (0, 0)),
            pl.BlockSpec((1, OUT), lambda i: (0, 0)),
        ],
        # Output block last dim == full array dim (10): 40 B/row writeback, no slice.
        out_specs=pl.BlockSpec((TB, OUT), lambda i: (i, 0)),
        compiler_params=pltpu.CompilerParams(
            dimension_semantics=("parallel",),     # v7x: shard batch over 2 TCs
            vmem_limit_bytes=48 * 1024 * 1024,     # cap <= ~48 MiB for v7x's 64 MiB VMEM
        ),
        cost_estimate=pl.CostEstimate(
            flops=flops, transcendentals=0, bytes_accessed=bytes_accessed),
    )(x, w1_b, b1_f, w2_b, b2_f, w3_b, b3_f)

    return out


def init_linear_params(key, fan_in, fan_out):
    """Deterministic init matching PyTorch nn.Linear default:
    weight, bias ~ U(-1/sqrt(fan_in), 1/sqrt(fan_in)).
    Returns weight in [in, out] layout (transposed vs. PyTorch) and bias [1, out]."""
    kw, kb = jax.random.split(key)
    bound = 1.0 / (fan_in ** 0.5)
    w = jax.random.uniform(kw, (fan_in, fan_out), jnp.float32, -bound, bound)
    b = jax.random.uniform(kb, (1, fan_out), jnp.float32, -bound, bound)
    return w, b


def reference_forward(x, w1, b1, w2, b2, w3, b3):
    """Pure-JAX reference with the same bf16-operand / f32-accumulate numerics."""
    xb = x.astype(jnp.bfloat16)
    h1 = jnp.dot(xb, w1.astype(jnp.bfloat16),
                 preferred_element_type=jnp.float32) + b1
    h1 = jnp.maximum(h1, 0.0)
    h2 = jnp.dot(h1.astype(jnp.bfloat16), w2.astype(jnp.bfloat16),
                 preferred_element_type=jnp.float32) + b2
    h2 = jnp.maximum(h2, 0.0)
    return jnp.dot(h2.astype(jnp.bfloat16), w3.astype(jnp.bfloat16),
                   preferred_element_type=jnp.float32) + b3


if __name__ == "__main__":
    key = jax.random.PRNGKey(0)
    k_x, k1, k2, k3 = jax.random.split(key, 4)

    B = 8  # small batch for the smoke test; tiling levers matter for B in the thousands
    x = jax.random.normal(k_x, (B, FEAT), jnp.float32)

    w1, b1 = init_linear_params(k1, FEAT, HID)
    w2, b2 = init_linear_params(k2, HID, HID)
    w3, b3 = init_linear_params(k3, HID, OUT)

    out = feedforward_mnist_reg(x, w1, b1, w2, b2, w3, b3)
    out = jax.block_until_ready(out)

    ref = reference_forward(x, w1, b1, w2, b2, w3, b3)
    assert out.shape == (B, OUT)
    # TODO(synk): bf16 MXU operands mean small deviations from a pure-f32 PyTorch forward.
    assert jnp.allclose(out, ref, atol=5e-3, rtol=5e-3), (
        f"max abs err {jnp.max(jnp.abs(out - ref))}")

    print("KERNEL_OK")
</pallas_src>

<mosaic_0001>
module attributes {stable_mosaic.version = 11 : i64} {
  func.func @mlp_kernel(%arg0: i32, %arg1: memref<8x784xf32, #tpu.memory_space<vmem>>, %arg2: memref<784x16xbf16, #tpu.memory_space<vmem>>, %arg3: memref<1x16xf32, #tpu.memory_space<vmem>>, %arg4: memref<16x16xbf16, #tpu.memory_space<vmem>>, %arg5: memref<1x16xf32, #tpu.memory_space<vmem>>, %arg6: memref<16x10xbf16, #tpu.memory_space<vmem>>, %arg7: memref<1x10xf32, #tpu.memory_space<vmem>>, %arg8: memref<8x10xf32, #tpu.memory_space<vmem>>) attributes {dimension_semantics = [#tpu.dimension_semantics<parallel>], iteration_bounds = array<i64: 1>, scalar_prefetch = 0 : i64, scratch_operands = 0 : i64, tpu.core_type = #tpu.core_type<tc>, window_params = [{transform_indices = @transform_0, window_bounds = array<i64: 8, 784>}, {pipeline_mode = #tpu.pipeline_mode<synchronous>, transform_indices = @transform_1, window_bounds = array<i64: 784, 16>}, {pipeline_mode = #tpu.pipeline_mode<synchronous>, transform_indices = @transform_2, window_bounds = array<i64: 1, 16>}, {pipeline_mode = #tpu.pipeline_mode<synchronous>, transform_indices = @transform_3, window_bounds = array<i64: 16, 16>}, {pipeline_mode = #tpu.pipeline_mode<synchronous>, transform_indices = @transform_4, window_bounds = array<i64: 1, 16>}, {pipeline_mode = #tpu.pipeline_mode<synchronous>, transform_indices = @transform_5, window_bounds = array<i64: 16, 10>}, {pipeline_mode = #tpu.pipeline_mode<synchronous>, transform_indices = @transform_6, window_bounds = array<i64: 1, 10>}, {transform_indices = @transform_7, window_bounds = array<i64: 8, 10>}]} {
    %c0 = arith.constant 0 : index
    %c0_0 = arith.constant 0 : index
    %0 = vector.load %arg1[%c0, %c0_0] : memref<8x784xf32, #tpu.memory_space<vmem>>, vector<8x784xf32>
    %1 = arith.truncf %0 : vector<8x784xf32> to vector<8x784xbf16>
    %c0_1 = arith.constant 0 : index
    %c0_2 = arith.constant 0 : index
    %2 = vector.load %arg2[%c0_1, %c0_2] : memref<784x16xbf16, #tpu.memory_space<vmem>>, vector<784x16xbf16>
    %cst = arith.constant dense<0.000000e+00> : vector<8x16xf32>
    %3 = tpu.matmul %1, %2, %cst {dimension_numbers = #tpu.dot_dimension_numbers<[1], [0], [0], [1], [0, 0, 1, 1], [], []>} : vector<8x784xbf16>, vector<784x16xbf16>, vector<8x16xf32> -> vector<8x16xf32>
    %c0_3 = arith.constant 0 : index
    %c0_4 = arith.constant 0 : index
    %4 = vector.load %arg3[%c0_3, %c0_4] : memref<1x16xf32, #tpu.memory_space<vmem>>, vector<1x16xf32>
    %5 = vector.broadcast %4 : vector<1x16xf32> to vector<8x16xf32>
    %6 = arith.addf %3, %5 : vector<8x16xf32>
    %cst_5 = arith.constant 0.000000e+00 : f32
    %7 = vector.broadcast %cst_5 : f32 to vector<8x16xf32>
    %8 = arith.maximumf %6, %7 : vector<8x16xf32>
    %9 = arith.truncf %8 : vector<8x16xf32> to vector<8x16xbf16>
    %c0_6 = arith.constant 0 : index
    %c0_7 = arith.constant 0 : index
    %10 = vector.load %arg4[%c0_6, %c0_7] : memref<16x16xbf16, #tpu.memory_space<vmem>>, vector<16x16xbf16>
    %cst_8 = arith.constant dense<0.000000e+00> : vector<8x16xf32>
    %11 = tpu.matmul %9, %10, %cst_8 {dimension_numbers = #tpu.dot_dimension_numbers<[1], [0], [0], [1], [0, 0, 1, 1], [], []>} : vector<8x16xbf16>, vector<16x16xbf16>, vector<8x16xf32> -> vector<8x16xf32>
    %c0_9 = arith.constant 0 : index
    %c0_10 = arith.constant 0 : index
    %12 = vector.load %arg5[%c0_9, %c0_10] : memref<1x16xf32, #tpu.memory_space<vmem>>, vector<1x16xf32>
    %13 = vector.broadcast %12 : vector<1x16xf32> to vector<8x16xf32>
    %14 = arith.addf %11, %13 : vector<8x16xf32>
    %cst_11 = arith.constant 0.000000e+00 : f32
    %15 = vector.broadcast %cst_11 : f32 to vector<8x16xf32>
    %16 = arith.maximumf %14, %15 : vector<8x16xf32>
    %17 = arith.truncf %16 : vector<8x16xf32> to vector<8x16xbf16>
    %c0_12 = arith.constant 0 : index
    %c0_13 = arith.constant 0 : index
    %18 = vector.load %arg6[%c0_12, %c0_13] : memref<16x10xbf16, #tpu.memory_space<vmem>>, vector<16x10xbf16>
    %cst_14 = arith.constant dense<0.000000e+00> : vector<8x10xf32>
    %19 = tpu.matmul %17, %18, %cst_14 {dimension_numbers = #tpu.dot_dimension_numbers<[1], [0], [0], [1], [0, 0, 1, 1], [], []>} : vector<8x16xbf16>, vector<16x10xbf16>, vector<8x10xf32> -> vector<8x10xf32>
    %c0_15 = arith.constant 0 : index
    %c0_16 = arith.constant 0 : index
    %20 = vector.load %arg7[%c0_15, %c0_16] : memref<1x10xf32, #tpu.memory_space<vmem>>, vector<1x10xf32>
    %21 = vector.broadcast %20 : vector<1x10xf32> to vector<8x10xf32>
    %22 = arith.addf %19, %21 : vector<8x10xf32>
    %c0_17 = arith.constant 0 : index
    %c0_18 = arith.constant 0 : index
    %23 = vector.load %arg8[%c0_17, %c0_18] : memref<8x10xf32, #tpu.memory_space<vmem>>, vector<8x10xf32>
    tpu.vector_store %arg8[%c0_17, %c0_18], %22 {strides = array<i32>} : memref<8x10xf32, #tpu.memory_space<vmem>>, vector<8x10xf32>,
    return
  }
  func.func @transform_0(%arg0: i32) -> (i32, i32) {
    %c0_i32 = arith.constant 0 : i32
    %c0_i32_0 = arith.constant 0 : i32
    return %arg0, %c0_i32 : i32, i32
  }
  func.func @transform_1(%arg0: i32) -> (i32, i32) {
    %c0_i32 = arith.constant 0 : i32
    %c0_i32_0 = arith.constant 0 : i32
    %c0_i32_1 = arith.constant 0 : i32
    return %c0_i32, %c0_i32_0 : i32, i32
  }
  func.func @transform_2(%arg0: i32) -> (i32, i32) {
    %c0_i32 = arith.constant 0 : i32
    %c0_i32_0 = arith.constant 0 : i32
    %c0_i32_1 = arith.constant 0 : i32
    return %c0_i32, %c0_i32_0 : i32, i32
  }
  func.func @transform_3(%arg0: i32) -> (i32, i32) {
    %c0_i32 = arith.constant 0 : i32
    %c0_i32_0 = arith.constant 0 : i32
    %c0_i32_1 = arith.constant 0 : i32
    return %c0_i32, %c0_i32_0 : i32, i32
  }
  func.func @transform_4(%arg0: i32) -> (i32, i32) {
    %c0_i32 = arith.constant 0 : i32
    %c0_i32_0 = arith.constant 0 : i32
    %c0_i32_1 = arith.constant 0 : i32
    return %c0_i32, %c0_i32_0 : i32, i32
  }
  func.func @transform_5(%arg0: i32) -> (i32, i32) {
    %c0_i32 = arith.constant 0 : i32
    %c0_i32_0 = arith.constant 0 : i32
    %c0_i32_1 = arith.constant 0 : i32
    return %c0_i32, %c0_i32_0 : i32, i32
  }
  func.func @transform_6(%arg0: i32) -> (i32, i32) {
    %c0_i32 = arith.constant 0 : i32
    %c0_i32_0 = arith.constant 0 : i32
    %c0_i32_1 = arith.constant 0 : i32
    return %c0_i32, %c0_i32_0 : i32, i32
  }
  func.func @transform_7(%arg0: i32) -> (i32, i32) {
    %c0_i32 = arith.constant 0 : i32
    %c0_i32_0 = arith.constant 0 : i32
    return %arg0, %c0_i32 : i32, i32
  }
}

</mosaic_0001>

<bundles_post_ra>
// kernel: feedforward_mnist_reg.1
= control target key start
LH: loop header
LB: loop body
LE: loop exit
PB: predicated region body
PF: predicated region fallthrough
CT: control target
= control target key end

     0   :  { %s1129_s0 = inlined_call_operand.vmem [shape: f32[8,784], index: 0, kind: input, shape index: {}]   ;;  %s1130_s1 = inlined_call_operand.vmem [shape: bf16[784,16], index: 1, kind: input, shape index: {}]   ;;  %s1131_s2 = inlined_call_operand.vmem [shape: f32[1,16], index: 2, kind: input, shape index: {}]   ;;  %s1132_s3 = inlined_call_operand.vmem [shape: bf16[16,16], index: 3, kind: input, shape index: {}]   ;;  %s1133_s4 = inlined_call_operand.vmem [shape: f32[1,16], index: 4, kind: input, shape index: {}]   ;;  %s1134_s5 = inlined_call_operand.vmem [shape: bf16[16,10], index: 5, kind: input, shape index: {}]   ;;  %s1135_s6 = inlined_call_operand.vmem [shape: f32[1,10], index: 6, kind: input, shape index: {}]   ;;  %s1136_s7 = inlined_call_operand.hbm [shape: f32[8,10], index: 7, kind: output, shape index: {}]  }
   0x1   :  { %v825_v0 = vld [vmem:[%s1130_s1 + $0x38] sm:$0xff]  ;;  %v824_v3 = vld [vmem:[%s1130_s1 + $0x30] sm:$0xff]  ;;  %v823_v8 = vld [vmem:[%s1130_s1 + $0x28] sm:$0xff] }
   0x2   :  { %v833_v1 = vld [vmem:[%s1130_s1 + $0x78] sm:$0xff]  ;;  %442 = vmatpush.bf16.msra.mxu0 %v825_v0  ;;  %v832_v4 = vld [vmem:[%s1130_s1 + $0x70] sm:$0xff]  ;;  %v831_v9 = vld [vmem:[%s1130_s1 + $0x68] sm:$0xff] }
   0x3   :  { %v841_v2 = vld [vmem:[%s1130_s1 + $0xb8] sm:$0xff]  ;;  %455 = vmatpush.bf16.msra.mxu1 %v833_v1  ;;  %v840_v5 = vld [vmem:[%s1130_s1 + $0xb0] sm:$0xff]  ;;  %v839_v10 = vld [vmem:[%s1130_s1 + $0xa8] sm:$0xff] }
   0x4   :  { %468 = vmatpush.bf16.msra.mxu2 %v841_v2  ;;  %v849_v6 = vld [vmem:[%s1130_s1 + $0xf8] sm:$0xff]  ;;  %v848_v7 = vld [vmem:[%s1130_s1 + $0xf0] sm:$0xff]  ;;  %v847_v11 = vld [vmem:[%s1130_s1 + $0xe8] sm:$0xff] }
   0x5   :  { %481 = vmatpush.bf16.msra.mxu3 %v849_v6  ;;  %v822_v12 = vld [vmem:[%s1130_s1 + $0x20] sm:$0xff]  ;;  %v821_v16 = vld [vmem:[%s1130_s1 + $0x18] sm:$0xff] }
   0x6   :  { %443 = vmatpush.bf16.msra.mxu0 %v824_v3  ;;  %v830_v13 = vld [vmem:[%s1130_s1 + $0x60] sm:$0xff]  ;;  %v829_v17 = vld [vmem:[%s1130_s1 + $0x58] sm:$0xff] }
   0x7   :  { %456 = vmatpush.bf16.msra.mxu1 %v832_v4  ;;  %v838_v14 = vld [vmem:[%s1130_s1 + $0xa0] sm:$0xff]  ;;  %v837_v18 = vld [vmem:[%s1130_s1 + $0x98] sm:$0xff] }
   0x8   :  { %469 = vmatpush.bf16.msra.mxu2 %v840_v5  ;;  %v846_v15 = vld [vmem:[%s1130_s1 + $0xe0] sm:$0xff]  ;;  %v845_v19 = vld [vmem:[%s1130_s1 + $0xd8] sm:$0xff] }
   0x9   :  { %482 = vmatpush.bf16.msra.mxu3 %v848_v7 }
   0xa   :  { %444 = vmatpush.bf16.msra.mxu0 %v823_v8 }
   0xb   :  { %457 = vmatpush.bf16.msra.mxu1 %v831_v9 }
   0xc   :  { %470 = vmatpush.bf16.msra.mxu2 %v839_v10 }
   0xd   :  { %483 = vmatpush.bf16.msra.mxu3 %v847_v11 }
   0xe   :  { %445 = vmatpush.bf16.msra.mxu0 %v822_v12 }
   0xf   :  { %458 = vmatpush.bf16.msra.mxu1 %v830_v13 }
  0x10   :  { %471 = vmatpush.bf16.msra.mxu2 %v838_v14 }
  0x11   :  { %484 = vmatpush.bf16.msra.mxu3 %v846_v15 }
  0x12   :  { %12 = vsyncpa [#allocation3], 0  ;;  %446 = vmatpush.bf16.msra.mxu0 %v821_v16  ;;  %v820_v20 = vld [vmem:[%s1130_s1 + $0x10] sm:$0xff]  ;;  %v819_v24 = vld [vmem:[%s1130_s1 + $0x8] sm:$0xff]  ;;  %vm438_vm0 = vcmask 130048   ;;  %s899_s26 = smov [#allocation2]  }
  0x13   :  { %459 = vmatpush.bf16.msra.mxu1 %v829_v17  ;;  %v828_v21 = vld [vmem:[%s1130_s1 + $0x50] sm:$0xff]  ;;  %v827_v25 = vld [vmem:[%s1130_s1 + $0x48] sm:$0xff]  ;;  %v818_v27 = vld [vmem:[%s1130_s1] sm:$0xff]  ;;  %s600_s27 = sshll.u32 %s899_s26, 4  ;;  %s602_s30 = sshll.u32 %s1136_s7, 4  ;;  %vm593_vm1 = vcmask 80896   ;;  %s601_s27 = int_to_ptr.vmem [resolvable:$true] %s600_s27  ;;  %s603_s30 = int_to_ptr.hbm [resolvable:$true] %s602_s30 }
  0x14   :  { %472 = vmatpush.bf16.msra.mxu2 %v837_v18  ;;  %v836_v22 = vld [vmem:[%s1130_s1 + $0x90] sm:$0xff]  ;;  %v835_v26 = vld [vmem:[%s1130_s1 + $0x88] sm:$0xff]  ;;  %v826_v29 = vld [vmem:[%s1130_s1 + $0x40] sm:$0xff] }
  0x15   :  { %485 = vmatpush.bf16.msra.mxu3 %v845_v19  ;;  %v844_v23 = vld [vmem:[%s1130_s1 + $0xd0] sm:$0xff]  ;;  %v843_v28 = vld [vmem:[%s1130_s1 + $0xc8] sm:$0xff]  ;;  %v28_v30 = vld [vmem:[%s1129_s0] sm:$0xff] }
  0x16   :  { %447 = vmatpush.bf16.msra.mxu0 %v820_v20  ;;  %v29_v31 = vld [vmem:[%s1129_s0 + $0x8] sm:$0xff]  ;;  %v857_v32 = vld [vmem:[%s1130_s1 + $0x138] sm:$0xff]  ;;  %v834_v34 = vld [vmem:[%s1130_s1 + $0x80] sm:$0xff]  ;;  %v35_v36 = vpack.c.bf16 %v28_v30, %v28_v30 }
  0x17   :  { %460 = vmatpush.bf16.msra.mxu1 %v828_v21  ;;  %v865_v33 = vld [vmem:[%s1130_s1 + $0x178] sm:$0xff]  ;;  %v30_v35 = vld [vmem:[%s1129_s0 + $0x10] sm:$0xff]  ;;  %v36_v37 = vpack.c.bf16 %v29_v31, %v29_v31  ;;  %v842_v38 = vld [vmem:[%s1130_s1 + $0xc0] sm:$0xff] }
  0x18   :  { %473 = vmatpush.bf16.msra.mxu2 %v836_v22  ;;  %v866_v39 = vld [vmem:[%s1130_s1 + $0x180] sm:$0xff]  ;;  %v31_v40 = vld [vmem:[%s1129_s0 + $0x18] sm:$0xff]  ;;  %v856_v41 = vld [vmem:[%s1130_s1 + $0x130] sm:$0xff]  ;;  %v37_v43 = vpack.c.bf16 %v30_v35, %v30_v35 }
  0x19   :  { %486 = vmatpush.bf16.msra.mxu3 %v844_v23  ;;  %v864_v42 = vld [vmem:[%s1130_s1 + $0x170] sm:$0xff]  ;;  %v38_v44 = vpack.c.bf16 %v31_v40, %v31_v40  ;;  %v855_v45 = vld [vmem:[%s1130_s1 + $0x128] sm:$0xff]  ;;  %v854_v47 = vld [vmem:[%s1130_s1 + $0x120] sm:$0xff] }
  0x1a   :  { %448 = vmatpush.bf16.msra.mxu0 %v819_v24  ;;  %v863_v46 = vld [vmem:[%s1130_s1 + $0x168] sm:$0xff]  ;;  %v862_v48 = vld [vmem:[%s1130_s1 + $0x160] sm:$0xff]  ;;  %v853_v49 = vld [vmem:[%s1130_s1 + $0x118] sm:$0xff] }
  0x1b   :  { %461 = vmatpush.bf16.msra.mxu1 %v827_v25  ;;  %v861_v50 = vld [vmem:[%s1130_s1 + $0x158] sm:$0xff]  ;;  %v34_v51 = vld [vmem:[%s1129_s0 + $0x30] sm:$0xff]  ;;  %v851_v55 = vld [vmem:[%s1130_s1 + $0x108] sm:$0xff] }
  0x1c   :  { %474 = vmatpush.bf16.msra.mxu2 %v835_v26  ;;  %v852_v52 = vld [vmem:[%s1130_s1 + $0x110] sm:$0xff]  ;;  %v41_v54 = vpack.c.bf16 %v34_v51, %v34_v51  ;;  %v859_v56 = vld [vmem:[%s1130_s1 + $0x148] sm:$0xff]  ;;  %v850_v57 = vld [vmem:[%s1130_s1 + $0x100] sm:$0xff] }
  0x1d   :  { %487 = vmatpush.bf16.msra.mxu3 %v843_v28  ;;  %v860_v53 = vld [vmem:[%s1130_s1 + $0x150] sm:$0xff]  ;;  %v858_v58 = vld [vmem:[%s1130_s1 + $0x140] sm:$0xff]  ;;  %v33_v60 = vld [vmem:[%s1129_s0 + $0x28] sm:$0xff] }
  0x1e   :  { %449 = vmatpush.bf16.msra.mxu0 %v818_v27  ;;  %v32_v59 = vld [vmem:[%s1129_s0 + $0x20] sm:$0xff]  ;;  %v40_v62 = vpack.c.bf16 %v33_v60, %v33_v60 }
  0x1f   :  { %462 = vmatpush.bf16.msra.mxu1 %v826_v29  ;;  %v39_v61 = vpack.c.bf16 %v32_v59, %v32_v59  ;;  %v867_v63 = vld [vmem:[%s1132_s3] sm:$0xff] }
  0x20   :  { %475 = vmatpush.bf16.msra.mxu2 %v834_v34  ;;  %v868_v4 = vld [vmem:[%s1134_s5] sm:$0xff] }
  0x21   :  { %450 = vmatmul.bf16.vlgmr.msra.gmra.mxu0 %v35_v36  ;;  %488 = vmatpush.bf16.msra.mxu3 %v842_v38  ;;  %v870_v7 = vld [vmem:[%s1131_s2] ss:$0 sm:$0xff] }
  0x22   :  { %494 = vmatpush.bf16.msrb.mxu0 %v857_v32  ;;  %463 = vmatmul.bf16.vlgmr.msra.gmra.mxu1 %v36_v37  ;;  %v871_v25 = vld [vmem:[%s1133_s4] ss:$0 sm:$0xff] }
  0x23   :  { %507 = vmatpush.bf16.msrb.mxu1 %v865_v33  ;;  %476 = vmatmul.bf16.vlgmr.msra.gmra.mxu2 %v37_v43  ;;  %v872_v31 = vld [vmem:[%s1135_s6] ss:$0 sm:$0xff] }
  0x24   :  { %527 = vmatpush.bf16.msrb.mxu2 %v866_v39  ;;  %489 = vmatmul.bf16.vlgmr.msra.gmra.mxu3 %v38_v44 }
  0x25   :  { %557 = vmatpush.bf16.msrb.mxu3 %v867_v63 }
  0x26   :  { %495 = vmatpush.bf16.msrb.mxu0 %v856_v41 }
  0x27   :  { %508 = vmatpush.bf16.msrb.mxu1 %v864_v42 }
  0x28   :  { %587 = vmatpush.bf16.msra.mxu2 %v868_v4 }
  0x2a   :  { %496 = vmatpush.bf16.msrb.mxu0 %v855_v45 }
  0x2b   :  { %509 = vmatpush.bf16.msrb.mxu1 %v863_v46 }
  0x2e   :  { %497 = vmatpush.bf16.msrb.mxu0 %v854_v47 }
  0x2f   :  { %510 = vmatpush.bf16.msrb.mxu1 %v862_v48 }
  0x32   :  { %498 = vmatpush.bf16.msrb.mxu0 %v853_v49 }
  0x33   :  { %511 = vmatpush.bf16.msrb.mxu1 %v861_v50  ;;  %807 = vmatmul.msk.bf16.vlgmr.msrb.gmra.mxu2 %vm438_vm0, %v41_v54 }
  0x36   :  { %499 = vmatpush.bf16.msrb.mxu0 %v852_v52 }
  0x37   :  { %512 = vmatpush.bf16.msrb.mxu1 %v860_v53 }
  0x3a   :  { %500 = vmatpush.bf16.msrb.mxu0 %v851_v55 }
  0x3b   :  { %513 = vmatpush.bf16.msrb.mxu1 %v859_v56 }
  0x3e   :  { %501 = vmatpush.bf16.msrb.mxu0 %v850_v57 }
  0x3f   :  { %514 = vmatpush.bf16.msrb.mxu1 %v858_v58 }
  0x41   :  { %502 = vmatmul.bf16.vlgmr.msrb.gmra.mxu0 %v39_v61 }
  0x42   :  { %515 = vmatmul.bf16.vlgmr.msrb.gmra.mxu1 %v40_v62 }
  0x9e   :  { %v451_v0 = vpop.f32.mrf.mxu0 }
  0x9f   :  { %v464_v1 = vpop.f32.mrf.mxu1  ;;  %v452_v8 = vadd.f32 %v870_v7, %v451_v0 }
  0xa1   :  { %v465_v11 = vadd.f32 %v464_v1, %v452_v8 }
  0xa6   :  { %v453_v2 = vpop.f32.mrf.mxu0  ;;  %v477_v5 = vpop.f32.mrf.mxu2 }
  0xa7   :  { %v466_v3 = vpop.f32.mrf.mxu1  ;;  %v490_v6 = vpop.f32.mrf.mxu3  ;;  %v478_v12 = vadd.f32 %v477_v5, %v465_v11 }
  0xa9   :  { %v491_v14 = vadd.f32 %v490_v6, %v478_v12 }
  0xae   :  { %v479_v9 = vpop.f32.mrf.mxu2 }
  0xaf   :  { %v492_v10 = vpop.f32.mrf.mxu3 }
  0xb6   :  { %v529_v13 = vpop.f32.mrf.mxu2 }
  0xbe   :  { %v503_v15 = vpop.f32.mrf.mxu0  ;;  %v531_v19 = vpop.f32.mrf.mxu2 }
  0xbf   :  { %v516_v16 = vpop.f32.mrf.mxu1  ;;  %v504_v17 = vadd.f32 %v503_v15, %v491_v14 }
  0xc1   :  { %v517_v18 = vadd.f32 %v516_v16, %v504_v17 }
  0xc3   :  { %v530_v20 = vadd.f32 %v529_v13, %v517_v18 }
  0xc5   :  { %v533_v21 = vmax.f32 %v530_v20, 0.0 }
  0xc6   :  { %v505_v22 = vpop.f32.mrf.mxu0 }
  0xc7   :  { %v518_v23 = vpop.f32.mrf.mxu1  ;;  %v534_v24 = vpack.c.bf16 %v533_v21, %v533_v21 }
  0xc9   :  { %812 = vmatmul.msk.bf16.vlgmr.msrb.gmra.mxu3 %vm438_vm0, %v534_v24 }
 0x14c   :  { %v559_v26 = vpop.f32.mrf.mxu3 }
 0x14d   :  { %v560_v27 = vadd.f32 %v871_v25, %v559_v26 }
 0x14f   :  { %v563_v28 = vmax.f32 %v560_v27, 0.0 }
 0x151   :  { %v564_v29 = vpack.c.bf16 %v563_v28, %v563_v28 }
 0x153   :  { %817 = vmatmul.msk.bf16.vlgmr.msra.gmra.mxu2 %vm438_vm0, %v564_v29 }
 0x154   :  { %v561_v30 = vpop.f32.mrf.mxu3 }
 0x1d6   :  { %v589_v32 = vpop.f32.mrf.mxu2 }
 0x1d7   :  { %v590_v33 = vadd.f32 %v872_v31, %v589_v32 }
 0x1d9   :  { %594 = vst.msk [vmem:[#allocation2] sm:$0xff] %vm593_vm1, %v590_v33 }
 0x1da   :  { %605 = dma.vmem_to_hbm [thread:$0]  %s601_s27, 128, %s603_s30, [#allocation3]  }
 0x1de   :  { %v591_v34 = vpop.f32.mrf.mxu2 }
 0x1df   :  { %897 = dma.done.wait [#allocation3], 128  }
 0x1e0   :  { %898 = vsyncadd [#allocation3], 4294967168 }
 0x1e1   :  { %610 = vsyncpa [#allocation3], 1 }

</bundles_post_ra>
